<compile_context>
chip_gen: v7x
topology: tpu7x:2x2x1
jax: 0.10.0
libtpu: 0.0.40
codegen_flags: <defaults>
</compile_context>

<pallas_src>
import jax
import jax.numpy as jnp
from jax.experimental import pallas as pl
from jax.experimental.pallas import tpu as pltpu


def _round_up(n, m):
    return ((n + m - 1) // m) * m


def dnn_kernel(x_ref,
               w1_ref, b1_ref,
               w2_ref, b2_ref,
               w3_ref, b3_ref,
               w4_ref, b4_ref,
               o_ref):
    """One (8, BLK) batch tile through the whole network, batch on lanes."""

    def layer(h, w_ref, b_ref):
        # (out, in) @ (in, BLK) -> (out, BLK); f32 accumulate on the MXU.
        z = jnp.dot(w_ref[...], h, preferred_element_type=jnp.float32)
        z = z + b_ref[...]                           # (out, 1) broadcasts over lanes
        e = jnp.exp(-z)                              # EUP
        return pl.reciprocal(1.0 + e, approx=True)   # EUP; leaves VALU slots free

    h = x_ref[...]
    h = layer(h, w1_ref, b1_ref)   # (32, BLK)
    h = layer(h, w2_ref, b2_ref)   # (8,  BLK)
    # NOTE: the 8->4 and 4->1 layers could be unrolled VPU FMAs + sublane
    # reduce to dodge MXU fill/drain latency on v6e/v7x; they are tiny either way.
    h = layer(h, w3_ref, b3_ref)   # (4,  BLK)
    h = layer(h, w4_ref, b4_ref)   # (1,  BLK)
    o_ref[...] = h.astype(o_ref.dtype)


def dnn_forward(x, params, *, block_b=2048, stream_dtype=jnp.float32):
    """Forward pass.

    x:      (B, 8) float32 (PyTorch convention).
    params: [(W, b), ...] with W in PyTorch (out, in) layout and b as (out, 1).
    block_b: batch tile width in the lane dim (multiple of 128).
    stream_dtype: dtype of x / W in HBM (bf16 halves HBM traffic at large B);
                  matmuls always accumulate in float32.

    Note: at tiny batches (B ~ 8) a hand kernel is pure launch/DMA overhead --
    let XLA fuse the four matmul+sigmoid ops there; this kernel targets the
    large mini-batch training / throughput path.
    """
    assert block_b % 128 == 0
    B = x.shape[0]
    (w1, b1), (w2, b2), (w3, b3), (w4, b4) = params

    # Feature-major: batch on the 128-lane axis.
    xt = x.T                                        # (8, B)
    blk = min(block_b, _round_up(B, 128))
    padded_b = _round_up(B, blk)
    if padded_b != B:
        xt = jnp.pad(xt, ((0, 0), (0, padded_b - B)))
    xt = xt.astype(stream_dtype)

    ws = [w.astype(stream_dtype) for w in (w1, w2, w3, w4)]
    bs = [b.astype(jnp.float32) for b in (b1, b2, b3, b4)]

    grid = (padded_b // blk,)

    # Full-array blocks with constant index_map -> stays VMEM-resident.
    resident = lambda a: pl.BlockSpec(a.shape, lambda i: (0, 0))

    out = pl.pallas_call(
        dnn_kernel,
        out_shape=jax.ShapeDtypeStruct((1, padded_b), jnp.float32),
        grid=grid,
        in_specs=[
            pl.BlockSpec((8, blk), lambda i: (0, i)),
            resident(ws[0]), resident(bs[0]),
            resident(ws[1]), resident(bs[1]),
            resident(ws[2]), resident(bs[2]),
            resident(ws[3]), resident(bs[3]),
        ],
        out_specs=pl.BlockSpec((1, blk), lambda i: (0, i)),
        compiler_params=pltpu.CompilerParams(
            dimension_semantics=("parallel",)),   # megacore split on v7x
    )(xt, ws[0], bs[0], ws[1], bs[1], ws[2], bs[2], ws[3], bs[3])

    return out[:, :B].T                             # (B, 1)


def init_params(key):
    """PyTorch nn.Linear-style init; W in (out, in) layout, b as (out, 1)."""
    dims = [(8, 32), (32, 8), (8, 4), (4, 1)]
    params = []
    for fan_in, fan_out in dims:
        key, kw, kb = jax.random.split(key, 3)
        bound = 1.0 / jnp.sqrt(jnp.float32(fan_in))
        w = jax.random.uniform(kw, (fan_out, fan_in), jnp.float32, -bound, bound)
        b = jax.random.uniform(kb, (fan_out, 1), jnp.float32, -bound, bound)
        params.append((w, b))
    return params


def reference_forward(x, params):
    h = x
    for w, b in params:
        h = jax.nn.sigmoid(h @ w.T + b.T)
    return h


if __name__ == "__main__":
    key = jax.random.PRNGKey(0)
    key, kx = jax.random.split(key)

    B = 300  # non-multiple of 128 to exercise padding + a 3-step batch grid
    x = jax.random.normal(kx, (B, 8), dtype=jnp.float32)
    params = init_params(key)

    y_ref = reference_forward(x, params)

    # f32 streaming path (tight check; approx reciprocal -> ~1e-3 tolerance).
    y = jax.block_until_ready(
        dnn_forward(x, params, block_b=128, stream_dtype=jnp.float32))
    assert y.shape == (B, 1), y.shape
    assert jnp.allclose(y, y_ref, atol=2e-3, rtol=0), (y[:4], y_ref[:4])

    # bf16 streaming path (halves HBM traffic at large B; f32 accumulate).
    y_bf16 = jax.block_until_ready(
        dnn_forward(x, params, block_b=128, stream_dtype=jnp.bfloat16))
    assert y_bf16.shape == (B, 1), y_bf16.shape
    assert jnp.allclose(y_bf16, y_ref, atol=3e-2, rtol=0), (y_bf16[:4], y_ref[:4])

    print("KERNEL_OK")
</pallas_src>

<mosaic_0001>
module attributes {stable_mosaic.version = 11 : i64} {
  func.func @dnn_kernel(%arg0: i32, %arg1: memref<8x128xf32, #tpu.memory_space<vmem>>, %arg2: memref<32x8xf32, #tpu.memory_space<vmem>>, %arg3: memref<32x1xf32, #tpu.memory_space<vmem>>, %arg4: memref<8x32xf32, #tpu.memory_space<vmem>>, %arg5: memref<8x1xf32, #tpu.memory_space<vmem>>, %arg6: memref<4x8xf32, #tpu.memory_space<vmem>>, %arg7: memref<4x1xf32, #tpu.memory_space<vmem>>, %arg8: memref<1x4xf32, #tpu.memory_space<vmem>>, %arg9: memref<1x1xf32, #tpu.memory_space<vmem>>, %arg10: memref<1x128xf32, #tpu.memory_space<vmem>>) attributes {dimension_semantics = [#tpu.dimension_semantics<parallel>], iteration_bounds = array<i64: 3>, scalar_prefetch = 0 : i64, scratch_operands = 0 : i64, tpu.core_type = #tpu.core_type<tc>, window_params = [{transform_indices = @transform_0, window_bounds = array<i64: 8, 128>}, {pipeline_mode = #tpu.pipeline_mode<synchronous>, transform_indices = @transform_1, window_bounds = array<i64: 32, 8>}, {pipeline_mode = #tpu.pipeline_mode<synchronous>, transform_indices = @transform_2, window_bounds = array<i64: 32, 1>}, {pipeline_mode = #tpu.pipeline_mode<synchronous>, transform_indices = @transform_3, window_bounds = array<i64: 8, 32>}, {pipeline_mode = #tpu.pipeline_mode<synchronous>, transform_indices = @transform_4, window_bounds = array<i64: 8, 1>}, {pipeline_mode = #tpu.pipeline_mode<synchronous>, transform_indices = @transform_5, window_bounds = array<i64: 4, 8>}, {pipeline_mode = #tpu.pipeline_mode<synchronous>, transform_indices = @transform_6, window_bounds = array<i64: 4, 1>}, {pipeline_mode = #tpu.pipeline_mode<synchronous>, transform_indices = @transform_7, window_bounds = array<i64: 1, 4>}, {pipeline_mode = #tpu.pipeline_mode<synchronous>, transform_indices = @transform_8, window_bounds = array<i64: 1, 1>}, {transform_indices = @transform_9, window_bounds = array<i64: 1, 128>}]} {
    %c0 = arith.constant 0 : index
    %c0_0 = arith.constant 0 : index
    %0 = vector.load %arg1[%c0, %c0_0] : memref<8x128xf32, #tpu.memory_space<vmem>>, vector<8x128xf32>
    %c0_1 = arith.constant 0 : index
    %c0_2 = arith.constant 0 : index
    %1 = vector.load %arg2[%c0_1, %c0_2] : memref<32x8xf32, #tpu.memory_space<vmem>>, vector<32x8xf32>
    %cst = arith.constant dense<0.000000e+00> : vector<32x128xf32>
    %2 = tpu.matmul %1, %0, %cst {dimension_numbers = #tpu.dot_dimension_numbers<[1], [0], [0], [1], [0, 0, 1, 1], [], []>} : vector<32x8xf32>, vector<8x128xf32>, vector<32x128xf32> -> vector<32x128xf32>
    %c0_3 = arith.constant 0 : index
    %c0_4 = arith.constant 0 : index
    %3 = vector.load %arg3[%c0_3, %c0_4] : memref<32x1xf32, #tpu.memory_space<vmem>>, vector<32x1xf32>
    %4 = vector.broadcast %3 : vector<32x1xf32> to vector<32x128xf32>
    %5 = arith.addf %2, %4 : vector<32x128xf32>
    %cst_5 = arith.constant 0.000000e+00 : f32
    %6 = vector.broadcast %cst_5 : f32 to vector<32x128xf32>
    %7 = arith.subf %6, %5 : vector<32x128xf32>
    %8 = math.exp %7 : vector<32x128xf32>
    %cst_6 = arith.constant 1.000000e+00 : f32
    %9 = vector.broadcast %cst_6 : f32 to vector<32x128xf32>
    %10 = arith.addf %9, %8 : vector<32x128xf32>
    %11 = tpu.reciprocal %10 {approx = true} : vector<32x128xf32> -> vector<32x128xf32>
    %c0_7 = arith.constant 0 : index
    %c0_8 = arith.constant 0 : index
    %12 = vector.load %arg4[%c0_7, %c0_8] : memref<8x32xf32, #tpu.memory_space<vmem>>, vector<8x32xf32>
    %cst_9 = arith.constant dense<0.000000e+00> : vector<8x128xf32>
    %13 = tpu.matmul %12, %11, %cst_9 {dimension_numbers = #tpu.dot_dimension_numbers<[1], [0], [0], [1], [0, 0, 1, 1], [], []>} : vector<8x32xf32>, vector<32x128xf32>, vector<8x128xf32> -> vector<8x128xf32>
    %c0_10 = arith.constant 0 : index
    %c0_11 = arith.constant 0 : index
    %14 = vector.load %arg5[%c0_10, %c0_11] : memref<8x1xf32, #tpu.memory_space<vmem>>, vector<8x1xf32>
    %15 = vector.broadcast %14 : vector<8x1xf32> to vector<8x128xf32>
    %16 = arith.addf %13, %15 : vector<8x128xf32>
    %cst_12 = arith.constant 0.000000e+00 : f32
    %17 = vector.broadcast %cst_12 : f32 to vector<8x128xf32>
    %18 = arith.subf %17, %16 : vector<8x128xf32>
    %19 = math.exp %18 : vector<8x128xf32>
    %cst_13 = arith.constant 1.000000e+00 : f32
    %20 = vector.broadcast %cst_13 : f32 to vector<8x128xf32>
    %21 = arith.addf %20, %19 : vector<8x128xf32>
    %22 = tpu.reciprocal %21 {approx = true} : vector<8x128xf32> -> vector<8x128xf32>
    %c0_14 = arith.constant 0 : index
    %c0_15 = arith.constant 0 : index
    %23 = vector.load %arg6[%c0_14, %c0_15] : memref<4x8xf32, #tpu.memory_space<vmem>>, vector<4x8xf32>
    %cst_16 = arith.constant dense<0.000000e+00> : vector<4x128xf32>
    %24 = tpu.matmul %23, %22, %cst_16 {dimension_numbers = #tpu.dot_dimension_numbers<[1], [0], [0], [1], [0, 0, 1, 1], [], []>} : vector<4x8xf32>, vector<8x128xf32>, vector<4x128xf32> -> vector<4x128xf32>
    %c0_17 = arith.constant 0 : index
    %c0_18 = arith.constant 0 : index
    %25 = vector.load %arg7[%c0_17, %c0_18] : memref<4x1xf32, #tpu.memory_space<vmem>>, vector<4x1xf32>
    %26 = vector.broadcast %25 : vector<4x1xf32> to vector<4x128xf32>
    %27 = arith.addf %24, %26 : vector<4x128xf32>
    %cst_19 = arith.constant 0.000000e+00 : f32
    %28 = vector.broadcast %cst_19 : f32 to vector<4x128xf32>
    %29 = arith.subf %28, %27 : vector<4x128xf32>
    %30 = math.exp %29 : vector<4x128xf32>
    %cst_20 = arith.constant 1.000000e+00 : f32
    %31 = vector.broadcast %cst_20 : f32 to vector<4x128xf32>
    %32 = arith.addf %31, %30 : vector<4x128xf32>
    %33 = tpu.reciprocal %32 {approx = true} : vector<4x128xf32> -> vector<4x128xf32>
    %c0_21 = arith.constant 0 : index
    %c0_22 = arith.constant 0 : index
    %34 = vector.load %arg8[%c0_21, %c0_22] : memref<1x4xf32, #tpu.memory_space<vmem>>, vector<1x4xf32>
    %cst_23 = arith.constant dense<0.000000e+00> : vector<1x128xf32>
    %35 = tpu.matmul %34, %33, %cst_23 {dimension_numbers = #tpu.dot_dimension_numbers<[1], [0], [0], [1], [0, 0, 1, 1], [], []>} : vector<1x4xf32>, vector<4x128xf32>, vector<1x128xf32> -> vector<1x128xf32>
    %c0_24 = arith.constant 0 : index
    %c0_25 = arith.constant 0 : index
    %36 = vector.load %arg9[%c0_24, %c0_25] : memref<1x1xf32, #tpu.memory_space<vmem>>, vector<1x1xf32>
    %37 = vector.broadcast %36 : vector<1x1xf32> to vector<1x128xf32>
    %38 = arith.addf %35, %37 : vector<1x128xf32>
    %cst_26 = arith.constant 0.000000e+00 : f32
    %39 = vector.broadcast %cst_26 : f32 to vector<1x128xf32>
    %40 = arith.subf %39, %38 : vector<1x128xf32>
    %41 = math.exp %40 : vector<1x128xf32>
    %cst_27 = arith.constant 1.000000e+00 : f32
    %42 = vector.broadcast %cst_27 : f32 to vector<1x128xf32>
    %43 = arith.addf %42, %41 : vector<1x128xf32>
    %44 = tpu.reciprocal %43 {approx = true} : vector<1x128xf32> -> vector<1x128xf32>
    %c0_28 = arith.constant 0 : index
    %c0_29 = arith.constant 0 : index
    %45 = vector.load %arg10[%c0_28, %c0_29] : memref<1x128xf32, #tpu.memory_space<vmem>>, vector<1x128xf32>
    tpu.vector_store %arg10[%c0_28, %c0_29], %44 {strides = array<i32>} : memref<1x128xf32, #tpu.memory_space<vmem>>, vector<1x128xf32>,
    return
  }
  func.func @transform_0(%arg0: i32) -> (i32, i32) {
    %c0_i32 = arith.constant 0 : i32
    %c0_i32_0 = arith.constant 0 : i32
    return %c0_i32, %arg0 : i32, i32
  }
  func.func @transform_1(%arg0: i32) -> (i32, i32) {
    %c0_i32 = arith.constant 0 : i32
    %c0_i32_0 = arith.constant 0 : i32
    %c0_i32_1 = arith.constant 0 : i32
    return %c0_i32, %c0_i32_0 : i32, i32
  }
  func.func @transform_2(%arg0: i32) -> (i32, i32) {
    %c0_i32 = arith.constant 0 : i32
    %c0_i32_0 = arith.constant 0 : i32
    %c0_i32_1 = arith.constant 0 : i32
    return %c0_i32, %c0_i32_0 : i32, i32
  }
  func.func @transform_3(%arg0: i32) -> (i32, i32) {
    %c0_i32 = arith.constant 0 : i32
    %c0_i32_0 = arith.constant 0 : i32
    %c0_i32_1 = arith.constant 0 : i32
    return %c0_i32, %c0_i32_0 : i32, i32
  }
  func.func @transform_4(%arg0: i32) -> (i32, i32) {
    %c0_i32 = arith.constant 0 : i32
    %c0_i32_0 = arith.constant 0 : i32
    %c0_i32_1 = arith.constant 0 : i32
    return %c0_i32, %c0_i32_0 : i32, i32
  }
  func.func @transform_5(%arg0: i32) -> (i32, i32) {
    %c0_i32 = arith.constant 0 : i32
    %c0_i32_0 = arith.constant 0 : i32
    %c0_i32_1 = arith.constant 0 : i32
    return %c0_i32, %c0_i32_0 : i32, i32
  }
  func.func @transform_6(%arg0: i32) -> (i32, i32) {
    %c0_i32 = arith.constant 0 : i32
    %c0_i32_0 = arith.constant 0 : i32
    %c0_i32_1 = arith.constant 0 : i32
    return %c0_i32, %c0_i32_0 : i32, i32
  }
  func.func @transform_7(%arg0: i32) -> (i32, i32) {
    %c0_i32 = arith.constant 0 : i32
    %c0_i32_0 = arith.constant 0 : i32
    %c0_i32_1 = arith.constant 0 : i32
    return %c0_i32, %c0_i32_0 : i32, i32
  }
  func.func @transform_8(%arg0: i32) -> (i32, i32) {
    %c0_i32 = arith.constant 0 : i32
    %c0_i32_0 = arith.constant 0 : i32
    %c0_i32_1 = arith.constant 0 : i32
    return %c0_i32, %c0_i32_0 : i32, i32
  }
  func.func @transform_9(%arg0: i32) -> (i32, i32) {
    %c0_i32 = arith.constant 0 : i32
    %c0_i32_0 = arith.constant 0 : i32
    return %c0_i32, %arg0 : i32, i32
  }
}

</mosaic_0001>

<bundles_post_ra>
// kernel: tpu_custom_call.1
= control target key start
LH: loop header
LB: loop body
LE: loop exit
PB: predicated region body
PF: predicated region fallthrough
CT: control target
= control target key end

     0   :  { %s1217_s0 = inlined_call_operand.vmem [shape: f32[8,384], index: 0, kind: input, shape index: {}]   ;;  %s1218_s1 = inlined_call_operand.vmem [shape: f32[32,8], index: 1, kind: input, shape index: {}]   ;;  %s1219_s2 = inlined_call_operand.vmem [shape: f32[32,1], index: 2, kind: input, shape index: {}]   ;;  %s1220_s3 = inlined_call_operand.vmem [shape: f32[8,32], index: 3, kind: input, shape index: {}]   ;;  %s1221_s4 = inlined_call_operand.vmem [shape: f32[8,1], index: 4, kind: input, shape index: {}]   ;;  %s1222_s5 = inlined_call_operand.vmem [shape: f32[4,8], index: 5, kind: input, shape index: {}]   ;;  %s1223_s6 = inlined_call_operand.vmem [shape: f32[4,1], index: 6, kind: input, shape index: {}]   ;;  %s1224_s7 = inlined_call_operand.vmem [shape: f32[1,4], index: 7, kind: input, shape index: {}]   ;;  %s1225_s8 = inlined_call_operand.<no memory space> [shape: f32[1,1], index: 8, kind: input, shape index: {}]   ;;  %s1226_s9 = inlined_call_operand.hbm [shape: f32[1,384], index: 9, kind: output, shape index: {}]  }
   0x1   :  { %v14_v0 = vstv %s1225_s8 }
   0x2   :  { %15 = vst [vmem:[#allocation2] sm:$0x1] %v14_v0 }
   0x3   :  { %16 = vsyncpa [#allocation4], 0 }
   0x4   :  { %18 = vsyncpa [#allocation4 + $0x1], 0  ;;  %s1070_s11 = smov 0   ;;  %s1072_s12 = smov 0  }
   0x5   :  { %s1074_s13 = smov 0   ;;  %s1076_s14 = smov 0  }
   0x6 LB: > { %s1091_s8 = sadd.s32 4294967295, %s1010_s14   ;;  %s810_s15 = sadd.s32 4294967294, %s1010_s14   ;;  %s1010_s14 = sphi %s1076_s14, %s1232_s14   ;;  %s1006_s13 = sphi %s1074_s13, %s1231_s13   ;;  %s1002_s12 = sphi %s1072_s12, %s1230_s12   ;;  %s998_s11 = sphi %s1070_s11, %s1229_s11  }
   0x7   : > { %s1095_s16 = sadd.s32 1, %s1010_s14   ;;  %s225_s17 = sadd.s32 1, %s1006_s13 }
   0x8   : > { %s222_s18 = ssub.s32 %s1010_s14, %s1095_s16  ;;  %p235_p0 = scmp.ne.s32.totalorder %s1006_s13, %s1002_s12 }
   0x9   : > { %p223_p1 = scmp.eq.s32.totalorder %s222_s18, 0  ;;  %p236_p2 = scmp.eq.s32.totalorder %s1091_s8, 2 }
   0xa   : > { %p241_p3 = scmp.ne.s32.totalorder %s1002_s12, %s998_s11  ;;  %p242_p4 = scmp.eq.s32.totalorder %s810_s15, 2 }
   0xb   : > { %s1106_s19 = scalar_select %p223_p1, %s1006_s13, %s225_s17  }
   0xc   : > { %p1108_p5 = por %p236_p2, %p235_p0  ;;  %p1112_p6 = por %p242_p4, %p241_p3 }
   0xd   : > { %p813_p7 = scmp.ge.s32.totalorder %s1010_s14, 1  ;;  %p291_p8 = scmp.lt.s32.totalorder %s1010_s14, 4 }
   0xf   : > { %p292_p9 = pnand %p813_p7, %p291_p8 }
  0x10   : > { %p325_p10 = scmp.lt.s32.totalorder (!%p292_p9), %s1091_s8, 2  ;;  %v330_v1 = vld [vmem:[%s1218_s1] sm:$0xff] (!%p292_p9)  ;;  %vm358_vm0 = vcmask (!%p292_p9), 64512   ;;  %v1012_v2 = vmov (!%p292_p9), 0   ;;  %v336_v4 = vld [vmem:[%s1219_s2 + $0x10] sm:$0xff] (!%p292_p9)  ;;  %v335_v5 = vld [vmem:[%s1219_s2 + $0x8] sm:$0xff] (!%p292_p9) }
  0x11   : > { %295 = sbr.rel (%p292_p9) target bundleno = 1025 (0x401), region = 56  ;;  %842 = vmatprep.mubr.msk.f32.mxu0 (!%p292_p9), %vm358_vm0, %v330_v1  ;;  %918 = vset.pattern.permute.xlu0 (!%p292_p9), %v1012_v2  ;;  %v334_v3 = vld [vmem:[%s1219_s2] sm:$0xff] (!%p292_p9)  ;;  %v337_v6 = vld [vmem:[%s1219_s2 + $0x18] sm:$0xff] (!%p292_p9)  ;;  %v331_v8 = vld [vmem:[%s1218_s1 + $0x8] sm:$0xff] (!%p292_p9)  ;;  %v1013_v14 = vmov (!%p292_p9), 0.0|0.0   ;;  %vm1014_vm1 = vmmov (!%p292_p9), 0  }
  0x12   : > { %340 = vperm.xlu0 (!%p292_p9), %918, %v334_v3   ;;  %919 = vset.pattern.permute.xlu1 (!%p292_p9), %v1012_v2  ;;  %v332_v9 = vld [vmem:[%s1218_s1 + $0x10] sm:$0xff] (!%p292_p9)  ;;  %v477_v10 = vld [vmem:[%s1221_s4] sm:$0xff] (!%p292_p9)  ;;  %v333_v12 = vld [vmem:[%s1218_s1 + $0x18] sm:$0xff] (!%p292_p9)  ;;  %v1015_v15 = vmov (!%p292_p9), 0.0   ;;  %vm483_vm2 = vcmask (!%p292_p9), 261120   ;;  %vm662_vm3 = vcmask (!%p292_p9), 1043456  }
  0x13   : > { %350 = vperm.xlu1 (!%p292_p9), %919, %v336_v4   ;;  %v563_v11 = vld [vmem:[%s1223_s6] sm:$0xf] (!%p292_p9)  ;;  %869 = vmatprep.subr.bf16.mxu1 (!%p292_p9), %v1013_v14  ;;  %vm658_vm4 = vcmask (!%p292_p9), 31744   ;;  %s323_s28 = sand.u32 (!%p292_p9), 1, %s1002_s12  }
  0x14   : > { %v648_v13 = vld [vmem:[#allocation2] sm:$0x1] (!%p292_p9)  ;;  %856 = vmatprep.mubr.msk.f32.mxu1 (!%p292_p9), %vm1014_vm1, %v1015_v15  ;;  %s324_s29 = scalar_lea.vmem (!%p292_p9), [#allocation3], %s323_s28  ;;  %s743_s18 = scalar_lea.sflag (!%p292_p9), [#allocation4], %s323_s28 }
  0x15   : > { %v476_v50 = vld [vmem:[%s1220_s3] sm:$0xff] (!%p292_p9)  ;;  %s755_s30 = sshll.u32 (!%p292_p9), %s324_s29, 4  ;;  %s1177_s30 = int_to_ptr.vmem [resolvable:$true] %s755_s30 }
  0x16   : > { %345 = vperm.xlu0 (!%p292_p9), %918, %v335_v5   ;;  %v562_v59 = vld [vmem:[%s1222_s5] sm:$0xf] (!%p292_p9)  ;;  %s948_s22 = scalar_lea.vmem (!%p292_p9), %s1177_s30, 16 }
  0x17   : > { %355 = vperm.xlu1 (!%p292_p9), %919, %v337_v6   ;;  %v647_v5 = vld [vmem:[%s1224_s7] sm:$0x1] (!%p292_p9)  ;;  %p949_p11 = scmp.ne.s32.totalorder (!%p292_p9), %s1177_s30, %s948_s22 }
  0x18   : > { %s326_s26 = scalar_select %p325_p10, %s1091_s8, 2 }
  0x19   : > { %p950_p12 = pnand %p949_p11, %p1108_p5 }
  0x1a   : > { %s814_s10 = sshll.u32 %s326_s26, 3  ;;  %480 = vperm.xlu0 %918, %v477_v10   ;;  %s823_s26 = sshll.u32 %s1091_s8, 4 }
  0x1b   : > { %s328_s23 = scalar_lea.vmem %s1217_s0, %s814_s10  ;;  %566 = vperm.xlu1 %919, %v563_v11   ;;  %s1175_s17 = scalar_lea.hbm %s1226_s9, %s823_s26 }
  0x1c   : > { %v329_v7 = vld [vmem:[%s328_s23] sm:$0xff]  ;;  %p951_p13 = pneg %p950_p12  ;;  %s1016_s8 = smov [#allocation3]  }
  0x1d   : > { %840 = vmatprep.subr.mxu0 %v329_v7  ;;  %s952_s23 = sshll.u32 %s1016_s8, 4  ;;  %s953_s23 = int_to_ptr.vmem [resolvable:$false] %s952_s23 }
  0x1e   : > { %841 = vmatpush3.msra.mxu0 %v329_v7  ;;  %651 = vperm.xlu0 %918, %v648_v13   ;;  %v654_v7 = vlaneseq  ;;  %s954_s24 = scalar_lea.vmem %s953_s23, 32  ;;  %p955_p0 = scmp.lt.s32.totalorder %s1177_s30, %s953_s23 }
  0x1f   : > { %843 = vmatmul.mubr.msk.f32.vlgmr.msra.gmra.mrb[0].mxu0 %vm358_vm0, %v331_v8  ;;  %859 = vmatprep.subr.mxu0 %v1015_v15  ;;  %p956_p1 = scmp.lt.s32.totalorder %s954_s24, %s948_s22 }
  0x20   : > { %845 = vmatprep.mubr.msk.f32.mxu0 %vm358_vm0, %v332_v9  ;;  %v655_v8 = vshrl.u32 %v654_v7, 7 }
  0x21   : > { %p957_p2 = por %p956_p1, %p955_p0 }
  0x22   : > { %v656_v9 = vsub.s32 0, %v655_v8 }
  0x23   : > { %846 = vmatmul.mubr.msk.f32.gmra.mrb[2].mxu0 %vm358_vm0, %v333_v12  ;;  %p958_p3 = pnand %p957_p2, %p951_p13 }
  0x24   : > { %861 = vmatprep.mubr.msk.f32.mxu0 %vm1014_vm1, %v1015_v15 }
  0x91   : > { %v341_v16 = vpop.permute.xlu0 %340 }
  0x92   : > { %v351_v17 = vpop.permute.xlu1 %350 }
  0x95   : > { %v346_v18 = vpop.permute.xlu0 %345 }
  0x96   : > { %v356_v24 = vpop.permute.xlu1 %355 }
  0x99   : > { %v481_v51 = vpop.permute.xlu0 %480 }
  0x9a   : > { %v567_v61 = vpop.permute.xlu1 %566 }
  0x9d   : > { %v652_v10 = vpop.permute.xlu0 %651 }
  0x9e   : > { %v657_v11 = vrot.slane %v652_v10, %v656_v9 }
  0xf2   : > { %v844_v19 = vpop.f32.mrb[0].mxu0 }
  0xf3   : > { %v443_v20 = vadd.f32 %v844_v19, %v346_v18  ;;  %v437_v21 = vpop.f32.mrb[1].mxu0 }
  0xf4   : > { %v438_v22 = vadd.f32 %v437_v21, %v341_v16 }
  0xf5   : > { %v457_v23 = vsub.f32 0.0, %v443_v20 }
  0xf6   : > { %v456_v25 = vsub.f32 0.0, %v438_v22  ;;  %v847_v26 = vpop.f32.mrb[2].mxu0 }
  0xf7   : > { %v462_v27 = vmul.f32 1.442695, %v457_v23  ;;  %v453_v28 = vadd.f32 %v847_v26, %v356_v24  ;;  %v447_v29 = vpop.f32.mrb[3].mxu0 }
  0xf8   : > { %v460_v30 = vmul.f32 1.442695, %v456_v25  ;;  %v448_v31 = vadd.f32 %v447_v29, %v351_v17 }
  0xf9   : > { %920 = vpow2.f32 %v462_v27  ;;  %v459_v32 = vsub.f32 0.0, %v453_v28 }
  0xfa   : > { %922 = vpow2.f32 %v460_v30  ;;  %v458_v33 = vsub.f32 0.0, %v448_v31 }
  0xfb   : > { %v466_v34 = vmul.f32 1.442695, %v459_v32 }
  0xfc   : > { %v464_v35 = vmul.f32 1.442695, %v458_v33 }
  0xfd   : > { %924 = vpow2.f32 %v466_v34 }
  0xfe   : > { %926 = vpow2.f32 %v464_v35 }
 0x103   : > { %v921_v36 = vpop.eup %920 }
 0x104   : > { %v923_v37 = vpop.eup %922  ;;  %v469_v38 = vadd.f32 1.0, %v921_v36 }
 0x105   : > { %v468_v39 = vadd.f32 1.0, %v923_v37 }
 0x106   : > { %928 = vrcp.f32 %v469_v38 }
 0x107   : > { %v925_v40 = vpop.eup %924  ;;  %930 = vrcp.f32 %v468_v39 }
 0x108   : > { %v927_v41 = vpop.eup %926  ;;  %v471_v42 = vadd.f32 1.0, %v925_v40 }
 0x109   : > { %v470_v43 = vadd.f32 1.0, %v927_v41 }
 0x10a   : > { %932 = vrcp.f32 %v471_v42 }
 0x10b   : > { %934 = vrcp.f32 %v470_v43 }
 0x110   : > { %v929_v44 = vpop.eup %928 }
 0x111   : > { %v931_v45 = vpop.eup %930 }
 0x112   : > { %v870_v46 = vpack.c.bf16 %v929_v44, %v931_v45 }
 0x114   : > { %v933_v47 = vpop.eup %932  ;;  %871 = vmatpush3.bf16.msra.mxu1 %v870_v46 }
 0x115   : > { %v935_v48 = vpop.eup %934  ;;  %872 = vmatprep.subr.bf16.mxu1 %v1013_v14 }
 0x116   : > { %v873_v49 = vpack.c.bf16 %v933_v47, %v935_v48 }
 0x118   : > { %874 = vmatpush3.bf16.msra.mxu1 %v873_v49 }
 0x119   : > { %864 = vmatprep.subr.mxu1 %v1015_v15 }
 0x11b   : > { %857 = vmatmul.mubr.msk.f32.vlgmr.msra.gmra.mrb[0].mxu1 %vm483_vm2, %v476_v50 }
 0x11c   : > { %866 = vmatprep.mubr.msk.f32.mxu1 %vm1014_vm1, %v1015_v15 }
 0x1ee   : > { %v553_v52 = vpop.f32.mrb[0].mxu1 }
 0x1ef   : > { %v554_v53 = vadd.f32 %v553_v52, %v481_v51  ;;  %v858_v54 = vpop.f32.mrb[1].mxu1 }
 0x1f1   : > { %v557_v55 = vsub.f32 0.0, %v554_v53 }
 0x1f3   : > { %v558_v56 = vmul.f32 1.442695, %v557_v55 }
 0x1f5   : > { %936 = vpow2.f32 %v558_v56 }
 0x1ff   : > { %v937_v57 = vpop.eup %936 }
 0x200   : > { %v560_v58 = vadd.f32 1.0, %v937_v57 }
 0x202   : > { %938 = vrcp.f32 %v560_v58 }
 0x20c   : > { %v939_v60 = vpop.eup %938 }
 0x20d   : > { %860 = vmatpush3.msra.mxu0 %v939_v60 }
 0x20e   : > { %862 = vmatmul.mubr.msk.f32.vlgmr.msra.gmra.mrb[4].mxu0 %vm358_vm0, %v562_v59 }
 0x2e1   : > { %v638_v62 = vpop.f32.mrb[4].mxu0 }
 0x2e2   : > { %v639_v63 = vadd.f32 %v638_v62, %v567_v61  ;;  %v863_v0 = vpop.f32.mrb[5].mxu0 }
 0x2e4   : > { %v642_v1 = vsub.f32 0.0, %v639_v63 }
 0x2e6   : > { %v643_v2 = vmul.f32 1.442695, %v642_v1 }
 0x2e8   : > { %940 = vpow2.f32 %v643_v2 }
 0x2f2   : > { %v941_v3 = vpop.eup %940 }
 0x2f3   : > { %v645_v4 = vadd.f32 1.0, %v941_v3 }
 0x2f5   : > { %942 = vrcp.f32 %v645_v4 }
 0x2ff   : > { %v943_v6 = vpop.eup %942 }
 0x300   : > { %865 = vmatpush3.msk.msra.mxu1 %vm662_vm3, %v943_v6 }
 0x301   : > { %867 = vmatmul.mubr.msk.f32.vlgmr.msra.gmra.mrb[2].mxu1 %vm658_vm4, %v647_v5 }
 0x3d4   : > { %v732_v12 = vpop.f32.mrb[2].mxu1 }
 0x3d5   : > { %v733_v13 = vadd.f32 %v732_v12, %v657_v11  ;;  %v868_v14 = vpop.f32.mrb[3].mxu1 }
 0x3d7   : > { %v736_v15 = vsub.f32 0.0, %v733_v13 }
 0x3d9   : > { %v737_v16 = vmul.f32 1.442695, %v736_v15 }
 0x3db   : > { %944 = vpow2.f32 %v737_v16 }
 0x3e5   : > { %v945_v17 = vpop.eup %944 }
 0x3e6   : > { %v739_v18 = vadd.f32 1.0, %v945_v17 }
 0x3e8   : > { %946 = vrcp.f32 %v739_v18 }
 0x3f2   : > { %v947_v19 = vpop.eup %946 }
 0x3f3   : > { %741 = vst [vmem:[%s324_s29] sm:$0x1] %v947_v19 }
 0x3f4   : > { %961 = shalt.err (!%p958_p3)
}
 0x3f5   : > { %s962_s25 = scalar_lea.hbm %s1175_s17, 16  ;;  %s966_s26 = scalar_lea.hbm %s1226_s9, 48 }
 0x3f6   : > { %p963_p4 = scmp.ne.s32.totalorder %s1175_s17, %s962_s25  ;;  %p967_p9 = scmp.lt.u32.totalorder %s1175_s17, %s1226_s9 }
 0x3f7   : > { %p968_p10 = scmp.lt.u32.totalorder %s966_s26, %s962_s25  ;;  %p970_p12 = scmp.lt.u32.totalorder %s962_s25, %s1175_s17 }
 0x3f8   : > { %p964_p7 = pnand %p963_p4, %p1108_p5 }
 0x3f9   : > { %p969_p11 = por %p968_p10, %p967_p9 }
 0x3fa   : > { %p965_p8 = pneg %p964_p7 }
 0x3fb   : > { %p971_p13 = por %p970_p12, %p969_p11 }
 0x3fd   : > { %p972_p0 = pnand %p971_p13, %p965_p8 }
 0x3ff   : > { %975 = shalt.err (!%p972_p0)
}
 0x400   : > { %875 = dma.vmem_to_hbm [thread:$0]  (%p1108_p5), %s1177_s30, 16, %s1175_s17, %s743_s18  }
 0x401 PF: > { %p881_p1 = scmp.ge.s32.totalorder %s1010_s14, 2  ;;  %s767_s10 = sand.u32 1, %s998_s11  }
 0x402   : > { %s768_s22 = scalar_lea.sflag [#allocation4], %s767_s10 }
 0x403   : > { %p878_p2 = pnand %p881_p1, %p1112_p6 }
 0x405   : > { %993 = dma.done.wait (!%p878_p2), %s768_s22, 16  }
 0x406   : > { %995 = vsyncadd (!%p878_p2), %s768_s22, 4294967280  ;;  %p21_p3 = scmp.ge.s32.totalorder %s1095_s16, 5   ;;  %s1229_s11 = smov %s1002_s12 }
 0x407   : > { %s1230_s12 = smov %s1006_s13  ;;  %s1231_s13 = smov %s1106_s19 }
 0x408   : > { %s1232_s14 = smov %s1095_s16  ;;  %23 = sbr.rel (!%p21_p3) target bundleno = 6 (0x6), region = 91 }
 0x40f   :  { %772 = vsyncpa [#allocation4], 1 }
 0x410   :  { %774 = vsyncpa [#allocation4 + $0x1], 1 }

</bundles_post_ra>
